<compile_context>
chip_gen: v6e
topology: v6e:2x2x1
jax: 0.10.0
libtpu: 0.0.40
codegen_flags: <defaults>
</compile_context>

<pallas_src>
import functools
import math

import jax
import jax.numpy as jnp
from jax.experimental import pallas as pl
from jax.experimental.pallas import tpu as pltpu


def _mf_kernel(inv_total_b, ue_ref, ie_ref, sc_ref, preds_ref, loss_ref,
               acc_ref):
    """One batch tile.

    ue_ref, ie_ref : [D, TB] f32  (feature on sublanes, batch on lanes)
    sc_ref         : [4, TB] f32  rows = (user_bias, item_bias, score, weight)
    preds_ref      : [1, TB] f32  lane-dense predictions for this tile
    loss_ref       : [1, 1]  f32  final (resident) loss output
    acc_ref        : [1, 1]  f32  VMEM scratch accumulating sum of wse
    """
    pid = pl.program_id(0)

    @pl.when(pid == 0)
    def _():
        acc_ref[...] = jnp.zeros_like(acc_ref)

    ue = ue_ref[...]                                   # [D, TB]
    ie = ie_ref[...]                                   # [D, TB]
    # per-example dot product: VPU multiply + sublane (XLU) reduce -> [1, TB]
    dot = jnp.sum(ue * ie, axis=0, keepdims=True)

    sc = sc_ref[...]                                   # [4, TB]
    ubias = sc[0:1, :]
    ibias = sc[1:2, :]
    target = sc[2:3, :]
    weight = sc[3:4, :]

    preds = dot + ubias + ibias                        # [1, TB]
    preds_ref[...] = preds                             # lane-dense store

    diff = preds - target
    # accumulate weighted squared error across tiles (padding has weight 0)
    acc_ref[...] += jnp.sum(diff * diff * weight, keepdims=True)
    # running normalized loss; final tile leaves the correct mean
    loss_ref[...] = acc_ref[...] * inv_total_b


def mf_weights_forward(users_emb, items_emb, users_bias, items_bias,
                       scores, sample_weight):
    """All inputs already gathered per-example. Returns (preds[B], loss[])."""
    B, D = users_emb.shape
    f32 = jnp.float32

    # Lane-aligned batch tiling: 128 lanes minimum, 512 for realistic batches.
    TB = 512 if B >= 512 else 128
    B_pad = ((B + TB - 1) // TB) * TB
    pad = B_pad - B
    n_tiles = B_pad // TB

    # Layout plumbing in the wrapper: batch onto lanes, fuse the scalar sides.
    ue_t = jnp.pad(users_emb.astype(f32).T, ((0, 0), (0, pad)))   # [D, B_pad]
    ie_t = jnp.pad(items_emb.astype(f32).T, ((0, 0), (0, pad)))   # [D, B_pad]
    scal = jnp.stack(
        [users_bias.astype(f32), items_bias.astype(f32),
         scores.astype(f32), sample_weight.astype(f32)], axis=0)  # [4, B]
    scal = jnp.pad(scal, ((0, 0), (0, pad)))                      # [4, B_pad]

    kernel = functools.partial(_mf_kernel, 1.0 / B)

    grid_spec = pltpu.PrefetchScalarGridSpec(
        num_scalar_prefetch=0,
        grid=(n_tiles,),
        in_specs=[
            pl.BlockSpec((D, TB), lambda i: (0, i)),
            pl.BlockSpec((D, TB), lambda i: (0, i)),
            pl.BlockSpec((4, TB), lambda i: (0, i)),
        ],
        out_specs=(
            pl.BlockSpec((1, TB), lambda i: (0, i)),
            pl.BlockSpec((1, 1), lambda i: (0, 0)),    # resident loss block
        ),
        scratch_shapes=[pltpu.VMEM((1, 1), jnp.float32)],
    )

    preds_pad, loss = pl.pallas_call(
        kernel,
        out_shape=(
            jax.ShapeDtypeStruct((1, B_pad), jnp.float32),
            jax.ShapeDtypeStruct((1, 1), jnp.float32),
        ),
        grid_spec=grid_spec,
        compiler_params=pltpu.CompilerParams(
            # batch axis carries the loss accumulator -> "arbitrary"
            dimension_semantics=("arbitrary",),
            vmem_limit_bytes=32 * 1024 * 1024,          # safe on v5e/v6e/v7x
        ),
    )(ue_t, ie_t, scal)

    return preds_pad[0, :B], loss[0, 0]


# ---------------------------------------------------------------------------
# Parameter setup (mirrors nn.init.kaiming_normal_(mode='fan_out', a=0))
# ---------------------------------------------------------------------------
def kaiming_normal_fan_out(key, shape):
    fan_out = shape[0]
    gain = math.sqrt(2.0)
    std = gain / math.sqrt(fan_out)
    return std * jax.random.normal(key, shape, dtype=jnp.float32)


if __name__ == "__main__":
    MAX_NUM_USER = 16
    MAX_NUM_ITEM = 16
    DIM = 32

    root = jax.random.PRNGKey(0)
    k_ue, k_ie, k_ub, k_ib, k_w = jax.random.split(root, 5)

    user_embedding = kaiming_normal_fan_out(k_ue, (MAX_NUM_USER, DIM))
    item_embedding = kaiming_normal_fan_out(k_ie, (MAX_NUM_ITEM, DIM))
    user_bias = kaiming_normal_fan_out(k_ub, (MAX_NUM_USER, 1))
    item_bias = kaiming_normal_fan_out(k_ib, (MAX_NUM_ITEM, 1))

    # Synthetic stand-in for np.loadtxt(weights_path): [users, items] weights.
    weights_matrix = jax.random.uniform(
        k_w, (MAX_NUM_USER, MAX_NUM_ITEM), minval=0.5, maxval=1.5,
        dtype=jnp.float32)

    def run_case(batch_size, seed):
        k_u, k_i, k_s = jax.random.split(jax.random.PRNGKey(seed), 3)
        users = jax.random.randint(k_u, (batch_size,), 0, MAX_NUM_USER,
                                   dtype=jnp.int32)
        items = jax.random.randint(k_i, (batch_size,), 0, MAX_NUM_ITEM,
                                   dtype=jnp.int32)
        scores = jax.random.uniform(k_s, (batch_size,), minval=1.0,
                                    maxval=5.0, dtype=jnp.float32)

        # Glue: embedding-table gathers in plain JAX (like nn.Embedding).
        users_emb = jnp.take(user_embedding, users, axis=0)       # [B, D]
        items_emb = jnp.take(item_embedding, items, axis=0)       # [B, D]
        users_b = jnp.take(user_bias, users, axis=0).reshape(-1)  # [B]
        items_b = jnp.take(item_bias, items, axis=0).reshape(-1)  # [B]
        sample_weight = weights_matrix[users, items]              # [B]

        preds, loss = mf_weights_forward(
            users_emb, items_emb, users_b, items_b, scores, sample_weight)
        jax.block_until_ready((preds, loss))

        # Reference check (pure JAX).
        ref_preds = (users_emb * items_emb).sum(-1) + users_b + items_b
        ref_loss = jnp.mean((ref_preds - scores) ** 2 * sample_weight)
        assert jnp.allclose(preds, ref_preds, atol=1e-4, rtol=1e-5)
        assert jnp.allclose(loss, ref_loss, atol=1e-4, rtol=1e-5)
        return preds, loss, sample_weight

    # Case 1: small batch (single tile).
    preds, loss, sample_weight = run_case(8, 1)
    # Case 2: multi-tile grid -> exercises cross-tile loss accumulation.
    run_case(300, 2)

    # Training-mode extras (weight_m / weight_v) are trivial host-side stats.
    weight_m = float(sample_weight.mean())
    weight_v = float(sample_weight.var(ddof=1))
    _ = {"loss_mse": float(loss), "weight_m": weight_m, "weight_v": weight_v,
         "score": preds.tolist()}

    print("KERNEL_OK")
</pallas_src>

<mosaic_0001>
module attributes {stable_mosaic.version = 11 : i64} {
  func.func @_mf_kernel(%arg0: i32, %arg1: memref<32x128xf32, #tpu.memory_space<vmem>>, %arg2: memref<32x128xf32, #tpu.memory_space<vmem>>, %arg3: memref<4x128xf32, #tpu.memory_space<vmem>>, %arg4: memref<1x128xf32, #tpu.memory_space<vmem>>, %arg5: memref<1x1xf32, #tpu.memory_space<vmem>>, %arg6: memref<1x1xf32, #tpu.memory_space<vmem>>) attributes {dimension_semantics = [#tpu.dimension_semantics<arbitrary>], iteration_bounds = array<i64: 1>, scalar_prefetch = 0 : i64, scratch_operands = 1 : i64, tpu.core_type = #tpu.core_type<tc>, window_params = [{transform_indices = @transform_0, window_bounds = array<i64: 32, 128>}, {transform_indices = @transform_1, window_bounds = array<i64: 32, 128>}, {transform_indices = @transform_2, window_bounds = array<i64: 4, 128>}, {transform_indices = @transform_3, window_bounds = array<i64: 1, 128>}, {pipeline_mode = #tpu.pipeline_mode<synchronous>, transform_indices = @transform_4, window_bounds = array<i64: 1, 1>}]} {
    %c0_i32 = arith.constant 0 : i32
    %0 = arith.cmpi eq, %arg0, %c0_i32 : i32
    %1 = arith.extui %0 : i1 to i32
    %c0_i32_0 = arith.constant 0 : i32
    %2 = arith.cmpi ne, %1, %c0_i32_0 : i32
    scf.if %2 {
      %cst_18 = arith.constant 0.000000e+00 : f32
      %31 = vector.broadcast %cst_18 : f32 to vector<1x1xf32>
      %c0_19 = arith.constant 0 : index
      %c0_20 = arith.constant 0 : index
      %32 = vector.load %arg6[%c0_19, %c0_20] : memref<1x1xf32, #tpu.memory_space<vmem>>, vector<1x1xf32>
      tpu.vector_store %arg6[%c0_19, %c0_20], %31 {strides = array<i32>} : memref<1x1xf32, #tpu.memory_space<vmem>>, vector<1x1xf32>,
    } else {
    }
    %c0 = arith.constant 0 : index
    %c0_1 = arith.constant 0 : index
    %3 = vector.load %arg1[%c0, %c0_1] : memref<32x128xf32, #tpu.memory_space<vmem>>, vector<32x128xf32>
    %c0_2 = arith.constant 0 : index
    %c0_3 = arith.constant 0 : index
    %4 = vector.load %arg2[%c0_2, %c0_3] : memref<32x128xf32, #tpu.memory_space<vmem>>, vector<32x128xf32>
    %5 = arith.mulf %3, %4 : vector<32x128xf32>
    %cst = arith.constant dense<0.000000e+00> : vector<128xf32>
    %6 = vector.multi_reduction <add>, %5, %cst [0] : vector<32x128xf32> to vector<128xf32>
    %7 = vector.shape_cast %6 : vector<128xf32> to vector<1x128xf32>
    %c0_4 = arith.constant 0 : index
    %c0_5 = arith.constant 0 : index
    %8 = vector.load %arg3[%c0_4, %c0_5] : memref<4x128xf32, #tpu.memory_space<vmem>>, vector<4x128xf32>
    %9 = vector.extract_strided_slice %8 {offsets = [0, 0], sizes = [1, 128], strides = [1, 1]} : vector<4x128xf32> to vector<1x128xf32>
    %10 = vector.extract_strided_slice %8 {offsets = [1, 0], sizes = [1, 128], strides = [1, 1]} : vector<4x128xf32> to vector<1x128xf32>
    %11 = vector.extract_strided_slice %8 {offsets = [2, 0], sizes = [1, 128], strides = [1, 1]} : vector<4x128xf32> to vector<1x128xf32>
    %12 = vector.extract_strided_slice %8 {offsets = [3, 0], sizes = [1, 128], strides = [1, 1]} : vector<4x128xf32> to vector<1x128xf32>
    %13 = arith.addf %7, %9 : vector<1x128xf32>
    %14 = arith.addf %13, %10 : vector<1x128xf32>
    %c0_6 = arith.constant 0 : index
    %c0_7 = arith.constant 0 : index
    %15 = vector.load %arg4[%c0_6, %c0_7] : memref<1x128xf32, #tpu.memory_space<vmem>>, vector<1x128xf32>
    tpu.vector_store %arg4[%c0_6, %c0_7], %14 {strides = array<i32>} : memref<1x128xf32, #tpu.memory_space<vmem>>, vector<1x128xf32>,
    %16 = arith.subf %14, %11 : vector<1x128xf32>
    %c0_8 = arith.constant 0 : index
    %c0_9 = arith.constant 0 : index
    %17 = vector.load %arg6[%c0_8, %c0_9] : memref<1x1xf32, #tpu.memory_space<vmem>>, vector<1x1xf32>
    %18 = arith.mulf %16, %16 : vector<1x128xf32>
    %19 = arith.mulf %18, %12 : vector<1x128xf32>
    %20 = vector.shape_cast %19 : vector<1x128xf32> to vector<1x1x128xf32>
    %cst_10 = arith.constant dense<0.000000e+00> : vector<1xf32>
    %21 = vector.multi_reduction <add>, %20, %cst_10 [1, 2] : vector<1x1x128xf32> to vector<1xf32>
    %22 = vector.shape_cast %21 : vector<1xf32> to vector<1x1x1xf32>
    %23 = vector.extract %22[0, 0, 0] : f32 from vector<1x1x1xf32>
    %24 = vector.broadcast %23 : f32 to vector<1x1xf32>
    %25 = arith.addf %17, %24 : vector<1x1xf32>
    %c0_11 = arith.constant 0 : index
    %c0_12 = arith.constant 0 : index
    %26 = vector.load %arg6[%c0_11, %c0_12] : memref<1x1xf32, #tpu.memory_space<vmem>>, vector<1x1xf32>
    tpu.vector_store %arg6[%c0_11, %c0_12], %25 {strides = array<i32>} : memref<1x1xf32, #tpu.memory_space<vmem>>, vector<1x1xf32>,
    %c0_13 = arith.constant 0 : index
    %c0_14 = arith.constant 0 : index
    %27 = vector.load %arg6[%c0_13, %c0_14] : memref<1x1xf32, #tpu.memory_space<vmem>>, vector<1x1xf32>
    %cst_15 = arith.constant 1.250000e-01 : f32
    %28 = vector.broadcast %cst_15 : f32 to vector<1x1xf32>
    %29 = arith.mulf %27, %28 : vector<1x1xf32>
    %c0_16 = arith.constant 0 : index
    %c0_17 = arith.constant 0 : index
    %30 = vector.load %arg5[%c0_16, %c0_17] : memref<1x1xf32, #tpu.memory_space<vmem>>, vector<1x1xf32>
    tpu.vector_store %arg5[%c0_16, %c0_17], %29 {strides = array<i32>} : memref<1x1xf32, #tpu.memory_space<vmem>>, vector<1x1xf32>,
    return
  }
  func.func @transform_0(%arg0: i32) -> (i32, i32) {
    %c0_i32 = arith.constant 0 : i32
    %c0_i32_0 = arith.constant 0 : i32
    return %c0_i32, %arg0 : i32, i32
  }
  func.func @transform_1(%arg0: i32) -> (i32, i32) {
    %c0_i32 = arith.constant 0 : i32
    %c0_i32_0 = arith.constant 0 : i32
    return %c0_i32, %arg0 : i32, i32
  }
  func.func @transform_2(%arg0: i32) -> (i32, i32) {
    %c0_i32 = arith.constant 0 : i32
    %c0_i32_0 = arith.constant 0 : i32
    return %c0_i32, %arg0 : i32, i32
  }
  func.func @transform_3(%arg0: i32) -> (i32, i32) {
    %c0_i32 = arith.constant 0 : i32
    %c0_i32_0 = arith.constant 0 : i32
    return %c0_i32, %arg0 : i32, i32
  }
  func.func @transform_4(%arg0: i32) -> (i32, i32) {
    %c0_i32 = arith.constant 0 : i32
    %c0_i32_0 = arith.constant 0 : i32
    %c0_i32_1 = arith.constant 0 : i32
    return %c0_i32, %c0_i32_0 : i32, i32
  }
}

</mosaic_0001>

<bundles_post_ra>
// kernel: tpu_custom_call.1
= control target key start
LH: loop header
LB: loop body
LE: loop exit
PB: predicated region body
PF: predicated region fallthrough
CT: control target
= control target key end

     0   :  { %10 = vsyncpa [#allocation4], 0  ;;  %s316_s0 = inlined_call_operand.hbm [shape: f32[32,128], index: 0, kind: input, shape index: {}]   ;;  %s317_s1 = inlined_call_operand.hbm [shape: f32[32,128], index: 1, kind: input, shape index: {}]   ;;  %s318_s2 = inlined_call_operand.hbm [shape: f32[4,128], index: 2, kind: input, shape index: {}]   ;;  %s319_s3 = inlined_call_operand.hbm [shape: f32[1,128], index: 3, kind: output, shape index: {0}]   ;;  %s320_s4 = inlined_call_operand.hbm [shape: f32[1,1], index: 4, kind: output, shape index: {1}]  }
   0x1   :  { %11 = vsyncpa [#allocation7], 0 }
   0x2   :  { %12 = vsyncpa [#allocation5], 0 }
   0x3   :  { %13 = vsyncpa [#allocation11], 0  ;;  %s265_s15 = smov [#allocation6]   ;;  %s266_s17 = smov [#allocation3]  }
   0x4   :  { %s31_s16 = sshll.u32 %s265_s15, 4  ;;  %s19_s18 = sshll.u32 %s266_s17, 4  ;;  %s32_s16 = int_to_ptr.vmem [resolvable:$true] %s31_s16  ;;  %s20_s18 = int_to_ptr.vmem [resolvable:$true] %s19_s18 }
   0x5   :  { %s165_s19 = scalar_lea.vmem %s32_s16, 512  ;;  %p170_p1 = scmp.lt.s32.totalorder %s32_s16, %s32_s16 }
   0x6   :  { %p166_p0 = scmp.ne.s32.totalorder %s32_s16, %s165_s19  ;;  %p171_p2 = scmp.lt.s32.totalorder %s165_s19, %s165_s19 }
   0x8   :  { %p172_p3 = por %p171_p2, %p170_p1 }
   0xa   :  { %p173_p4 = pnand %p172_p3, %p166_p0 }
   0xc   :  { %176 = shalt.err (!%p173_p4)
}
   0xd   :  { %s267_s20 = smov 128   ;;  %s268_s21 = smov 8  }
   0xe   :  { %37 = dma.hbm_to_vmem [thread:$0]  %s317_s1, 512, %s32_s16, [#allocation7], %s267_s20, %s267_s20, %s268_s21  }
   0xf   :  { %s185_s24 = scalar_lea.vmem %s20_s18, 512  ;;  %p190_p6 = scmp.lt.s32.totalorder %s20_s18, %s20_s18 }
  0x10   :  { %p186_p5 = scmp.ne.s32.totalorder %s20_s18, %s185_s24  ;;  %p191_p7 = scmp.lt.s32.totalorder %s185_s24, %s185_s24 }
  0x12   :  { %p192_p8 = por %p191_p7, %p190_p6 }
  0x14   :  { %p193_p9 = pnand %p192_p8, %p186_p5 }
  0x16   :  { %196 = shalt.err (!%p193_p9)
}
  0x17   :  { %25 = dma.hbm_to_vmem [thread:$0]  %s316_s0, 512, %s20_s18, [#allocation4], %s267_s20, %s267_s20, %s268_s21  }
  0x18   :  { %s269_s27 = smov [#allocation8]  }
  0x19   :  { %s44_s28 = sshll.u32 %s269_s27, 4  ;;  %s45_s28 = int_to_ptr.vmem [resolvable:$true] %s44_s28 }
  0x1a   :  { %s205_s29 = scalar_lea.vmem %s45_s28, 64  ;;  %p210_p11 = scmp.lt.s32.totalorder %s45_s28, %s45_s28 }
  0x1b   :  { %p206_p10 = scmp.ne.s32.totalorder %s45_s28, %s205_s29  ;;  %p211_p12 = scmp.lt.s32.totalorder %s205_s29, %s205_s29 }
  0x1d   :  { %p212_p13 = por %p211_p12, %p210_p11 }
  0x1f   :  { %p213_p0 = pnand %p212_p13, %p206_p10 }
  0x21   :  { %216 = shalt.err (!%p213_p0)
}
  0x22   :  { %47 = dma.hbm_to_vmem [thread:$0]  %s318_s2, 64, %s45_s28, [#allocation7]  }
  0x23   :  { %257 = dma.done.wait [#allocation4], 512  }
  0x24   :  { %258 = vsyncadd [#allocation4], 4294966784 }
  0x25   :  { %259 = dma.done.wait [#allocation7], 576  }
  0x26   :  { %260 = vsyncadd [#allocation7], 4294966720  ;;  %v63_v0 = vld [vmem:[#allocation3] sm:$0xff]  ;;  %v64_v1 = vld [vmem:[#allocation3 + $0x8] sm:$0xff]  ;;  %vm99_vm0 = vcmask 1040384   ;;  %vm61_vm1 = vcmask 0  }
  0x27   :  { %v65_v2 = vld [vmem:[#allocation3 + $0x10] sm:$0xff]  ;;  %v66_v3 = vld [vmem:[#allocation3 + $0x18] sm:$0xff]  ;;  %v67_v4 = vld [vmem:[#allocation6] sm:$0xff]  ;;  %v270_v31 = vmov 0.0   ;;  %s271_s0 = smov [#allocation9]  }
  0x28   :  { %v68_v5 = vld [vmem:[#allocation6 + $0x8] sm:$0xff]  ;;  %v69_v6 = vld [vmem:[#allocation6 + $0x10] sm:$0xff]  ;;  %v70_v7 = vld [vmem:[#allocation6 + $0x18] sm:$0xff]  ;;  %v71_v8 = vmul.f32 %v67_v4, %v63_v0  ;;  %62 = vst.msk [vmem:[#allocation2] sm:$0x1] %vm61_vm1, %v270_v31  ;;  %s123_s2 = sshll.u32 %s271_s0, 4  ;;  %s124_s2 = int_to_ptr.vmem [resolvable:$true] %s123_s2 }
  0x29   :  { %v72_v9 = vmul.f32 %v68_v5, %v64_v1  ;;  %v73_v10 = vmul.f32 %v69_v6, %v65_v2  ;;  %v74_v11 = vmul.f32 %v70_v7, %v66_v3  ;;  %v84_v19 = vld [vmem:[#allocation8] sm:$0xf]  ;;  %s217_s5 = scalar_lea.vmem %s124_s2, 16  ;;  %s221_s6 = scalar_lea.vmem %s124_s2, 32 }
  0x2a   :  { %v87_v22 = vrot.slane %v84_v19, 1  ;;  %v91_v24 = vrot.slane %v84_v19, 2  ;;  %v96_v27 = vrot.slane %v84_v19, 3  ;;  %p218_p1 = scmp.ne.s32.totalorder %s124_s2, %s217_s5  ;;  %p222_p2 = scmp.lt.s32.totalorder %s124_s2, %s124_s2 }
  0x2b   :  { %v75_v12 = vadd.f32 %v72_v9, %v71_v8  ;;  %p223_p3 = scmp.lt.s32.totalorder %s221_s6, %s217_s5 }
  0x2d   :  { %v76_v13 = vadd.f32 %v75_v12, %v73_v10  ;;  %p224_p4 = por %p223_p3, %p222_p2 }
  0x2f   :  { %v77_v14 = vadd.f32 %v76_v13, %v74_v11  ;;  %p225_p5 = pnand %p224_p4, %p218_p1 }
  0x31   :  { %v78_v15 = vrot.slane %v77_v14, 4 }
  0x33   :  { %v79_v16 = vadd.f32 %v78_v15, %v77_v14 }
  0x35   :  { %v80_v17 = vrot.slane %v79_v16, 2 }
  0x37   :  { %v81_v18 = vadd.f32 %v80_v17, %v79_v16 }
  0x39   :  { %v82_v20 = vrot.slane %v81_v18, 1 }
  0x3b   :  { %v83_v21 = vadd.f32 %v82_v20, %v81_v18 }
  0x3d   :  { %v85_v23 = vadd.f32 %v84_v19, %v83_v21 }
  0x3f   :  { %v89_v25 = vadd.f32 %v87_v22, %v85_v23 }
  0x41   :  { %v93_v26 = vsub.f32 %v89_v25, %v91_v24  ;;  %90 = vst [vmem:[#allocation9] sm:$0x1] %v89_v25 }
  0x43   :  { %v95_v28 = vmul.f32 %v93_v26, %v93_v26 }
  0x45   :  { %v98_v29 = vmul.f32 %v96_v27, %v95_v28 }
  0x47   :  { %v100_v30 = vsel %vm99_vm0, %v98_v29, 0.0 }
  0x48   :  { %101 = vadd.xlane.f32.xlu0 %v100_v30 }
  0x49   :  { %228 = shalt.err (!%p225_p5)
}
  0x4a   :  { %126 = dma.vmem_to_hbm [thread:$0]  %s124_s2, 16, %s319_s3, [#allocation5]   ;;  %v94_v39 = vld [vmem:[#allocation2] sm:$0x1] }
  0x4b   :  { %s272_s10 = smov [#allocation10]  }
  0x4c   :  { %s133_s11 = sshll.u32 %s272_s10, 4  ;;  %s134_s11 = int_to_ptr.vmem [resolvable:$true] %s133_s11 }
  0x4d   :  { %s237_s3 = scalar_lea.vmem %s134_s11, 16  ;;  %s241_s12 = scalar_lea.vmem %s134_s11, 32 }
  0x4e   :  { %p238_p6 = scmp.ne.s32.totalorder %s134_s11, %s237_s3  ;;  %p242_p7 = scmp.lt.s32.totalorder %s134_s11, %s134_s11 }
  0x4f   :  { %p243_p8 = scmp.lt.s32.totalorder %s241_s12, %s237_s3 }
  0x51   :  { %p244_p9 = por %p243_p8, %p242_p7 }
  0x53   :  { %p245_p10 = pnand %p244_p9, %p238_p6 }
  0xd1   :  { %v102_v32 = vpop.xlane.xlu0 %101 }
  0xd2   :  { %v103_v33 = vrot.slane %v102_v32, 4 }
  0xd4   :  { %v104_v34 = vadd.f32 %v103_v33, %v102_v32 }
  0xd6   :  { %v105_v35 = vrot.slane %v104_v34, 2 }
  0xd8   :  { %v106_v36 = vadd.f32 %v105_v35, %v104_v34 }
  0xda   :  { %v107_v37 = vrot.slane %v106_v36, 1 }
  0xdc   :  { %v108_v38 = vadd.f32 %v107_v37, %v106_v36 }
  0xde   :  { %147 = vpush %v108_v38 }
 0x10f   :  { %s148_s9 = spop %147 }
 0x110   :  { %v110_v40 = vstv %s148_s9 }
 0x111   :  { %v111_v41 = vadd.f32 %v110_v40, %v94_v39 }
 0x113   :  { %113 = vst.msk [vmem:[#allocation2] sm:$0x1] %vm61_vm1, %v111_v41 }
 0x11a   :  { %v114_v42 = vld [vmem:[#allocation2] sm:$0x1] }
 0x11b   :  { %v115_v43 = vmul.f32 0.125, %v114_v42 }
 0x11d   :  { %116 = vst.msk [vmem:[#allocation10] sm:$0x1] %vm61_vm1, %v115_v43 }
 0x11e   :  { %248 = shalt.err (!%p245_p10)
}
 0x11f   :  { %136 = dma.vmem_to_hbm [thread:$0]  %s134_s11, 16, %s320_s4, [#allocation11]  }
 0x120   :  { %261 = dma.done.wait [#allocation5], 16  }
 0x121   :  { %262 = vsyncadd [#allocation5], 4294967280 }
 0x122   :  { %263 = dma.done.wait [#allocation11], 16  }
 0x123   :  { %264 = vsyncadd [#allocation11], 4294967280 }
 0x124   :  { %143 = vsyncpa [#allocation4], 1 }
 0x125   :  { %144 = vsyncpa [#allocation7], 1 }
 0x126   :  { %145 = vsyncpa [#allocation5], 1 }
 0x127   :  { %146 = vsyncpa [#allocation11], 1 }

</bundles_post_ra>
